<compile_context>
chip_gen: v5e
topology: v5e:2x2
jax: 0.10.0
libtpu: 0.0.40
codegen_flags: <defaults>
</compile_context>

<pallas_src>
import functools

import jax
import jax.numpy as jnp
from jax import lax
from jax.experimental import pallas as pl
from jax.experimental.pallas import tpu as pltpu


def _sq_diff_partial_kernel(yhat_ref, y_ref, psum_ref, *, tm, C, M, npc, need_mask):
    """Accumulates sum((yhat - y)^2) into a (1, 8, C) f32 partial-sum block."""
    j = pl.program_id(1)  # reduction axis (row-blocks owned by this core)

    @pl.when(j == 0)
    def _init():
        psum_ref[...] = jnp.zeros_like(psum_ref)

    d = yhat_ref[...].astype(jnp.float32) - y_ref[...].astype(jnp.float32)

    if need_mask:
        # Mask rows past the true row count M.  Uses the *unclamped* block
        # index, so a phantom block (odd megacore split) masks to all-zero.
        blk = pl.program_id(0) * npc + j
        row = blk * tm + lax.broadcasted_iota(jnp.int32, (tm, 1), 0)
        d = jnp.where(row < M, d, 0.0)

    sq = d * d
    # Fold tm rows into an (8, C) sublane-shaped accumulator: pure VPU adds,
    # no per-step cross-lane/sublane reduce.  Final combine happens outside.
    psum_ref[...] += jnp.sum(sq.reshape(tm // 8, 8, C), axis=0)[None]


def rmse_loss(yhat, y, eps=1e-8):
    """Pallas-backed RMSE loss, matching torch.sqrt(F.mse_loss(yhat, y) + eps)."""
    assert yhat.shape == y.shape, "yhat and y must have the same shape"
    total = int(yhat.size)
    itemsize = jnp.dtype(yhat.dtype).itemsize

    # Lane dim: largest of {512, 256, 128} dividing total -> free reshape,
    # no padding copy.  Otherwise fall back to 512 + zero-pad (rare for NN
    # tensors; zeros contribute 0 to the squared-diff sum).
    if total % 128 == 0:
        C = 512 if total % 512 == 0 else (256 if total % 256 == 0 else 128)
    else:
        C = 512
    M = max(-(-total // C), 8)          # rows; >= 8 so tiles satisfy (8,128)
    pad = M * C - total                 # 0 on the fast path

    # ~2 MiB per input block (multiple of 8 rows, <= M).
    target_block_bytes = 2 * 1024 * 1024
    tm_target = max(8, (target_block_bytes // (C * itemsize)) // 8 * 8)
    tm = min(tm_target, (M // 8) * 8)
    nb_total = -(-M // tm)              # total row-blocks over the array
    P = 2 if nb_total >= 2 else 1       # megacore split (v7x); no-op on 1-TC chips
    npc = -(-nb_total // P)             # row-blocks per core
    need_clamp = (P * npc != nb_total)  # odd split -> core 1 has one phantom block
    need_mask = (P * npc * tm != M)     # ragged rows and/or phantom block

    yhat_f = yhat.reshape(-1)
    y_f = y.reshape(-1)
    if pad:
        yhat_f = jnp.pad(yhat_f, (0, pad))
        y_f = jnp.pad(y_f, (0, pad))
    yhat2 = yhat_f.reshape(M, C)        # native dtype; cast to f32 in-kernel
    y2 = y_f.reshape(M, C)

    if need_clamp:
        in_map = lambda p, j: (jnp.minimum(p * npc + j, nb_total - 1), 0)
    else:
        in_map = lambda p, j: (p * npc + j, 0)

    kernel = functools.partial(
        _sq_diff_partial_kernel, tm=tm, C=C, M=M, npc=npc, need_mask=need_mask
    )

    cost = pl.CostEstimate(
        flops=3 * total,
        transcendentals=0,
        bytes_accessed=2 * total * itemsize + P * 8 * C * 4,
    )

    partials = pl.pallas_call(
        kernel,
        out_shape=jax.ShapeDtypeStruct((P, 8, C), jnp.float32),
        grid_spec=pltpu.PrefetchScalarGridSpec(
            num_scalar_prefetch=0,
            grid=(P, npc),
            in_specs=[
                pl.BlockSpec((tm, C), in_map),
                pl.BlockSpec((tm, C), in_map),
            ],
            out_specs=pl.BlockSpec((1, 8, C), lambda p, j: (p, 0, 0)),
        ),
        compiler_params=pltpu.CompilerParams(
            dimension_semantics=("parallel", "arbitrary"),
            vmem_limit_bytes=32 * 1024 * 1024,
        ),
        cost_estimate=cost,
    )(yhat2, y2)

    ss = jnp.sum(partials, dtype=jnp.float32)
    inv_total = 1.0 / float(total)      # exact in float64, rounded once
    return jnp.sqrt(ss * jnp.float32(inv_total) + jnp.float32(eps))


def _ref_rmse(yhat, y, eps=1e-8):
    return jnp.sqrt(jnp.mean((yhat - y) ** 2) + eps)


if __name__ == "__main__":
    key = jax.random.PRNGKey(0)

    # 1) Main shape consistent with LSTM training outputs: (batch, seq, hidden).
    k1, k2 = jax.random.split(key)
    yhat = jax.random.normal(k1, (2, 8, 128), dtype=jnp.float32)
    y = jax.random.normal(k2, (2, 8, 128), dtype=jnp.float32)
    loss = rmse_loss(yhat, y)
    jax.block_until_ready(loss)
    assert jnp.allclose(loss, _ref_rmse(yhat, y), rtol=1e-5, atol=1e-6), loss

    # 2) Zero-pad-free path with ragged rows + 2-core split (total = 9 * 512).
    k3, k4 = jax.random.split(k1)
    a = jax.random.normal(k3, (2, 9, 256), dtype=jnp.float32)
    b = jax.random.normal(k4, (2, 9, 256), dtype=jnp.float32)
    l2 = rmse_loss(a, b)
    jax.block_until_ready(l2)
    assert jnp.allclose(l2, _ref_rmse(a, b), rtol=1e-5, atol=1e-6), l2

    # 3) Non-128-multiple size -> pad fallback path.
    k5, k6 = jax.random.split(k2)
    c = jax.random.normal(k5, (3, 7, 33), dtype=jnp.float32)
    d = jax.random.normal(k6, (3, 7, 33), dtype=jnp.float32)
    l3 = rmse_loss(c, d)
    jax.block_until_ready(l3)
    assert jnp.allclose(l3, _ref_rmse(c, d), rtol=1e-5, atol=1e-6), l3

    print("KERNEL_OK")
</pallas_src>

<mosaic_0001>
module attributes {stable_mosaic.version = 11 : i64} {
  func.func @_sq_diff_partial_kernel(%arg0: i32, %arg1: i32, %arg2: memref<8x512xf32, #tpu.memory_space<vmem>>, %arg3: memref<8x512xf32, #tpu.memory_space<vmem>>, %arg4: memref<1x8x512xf32, #tpu.memory_space<vmem>>) attributes {dimension_semantics = [#tpu.dimension_semantics<parallel>, #tpu.dimension_semantics<arbitrary>], iteration_bounds = array<i64: 1, 1>, scalar_prefetch = 0 : i64, scratch_operands = 0 : i64, tpu.core_type = #tpu.core_type<tc>, window_params = [{transform_indices = @transform_0, window_bounds = array<i64: 8, 512>}, {transform_indices = @transform_1, window_bounds = array<i64: 8, 512>}, {transform_indices = @transform_2, window_bounds = array<i64: 1, 8, 512>}]} {
    %c0_i32 = arith.constant 0 : i32
    %0 = arith.cmpi eq, %arg1, %c0_i32 : i32
    %1 = arith.extui %0 : i1 to i32
    %c0_i32_0 = arith.constant 0 : i32
    %2 = arith.cmpi ne, %1, %c0_i32_0 : i32
    scf.if %2 {
      %cst_10 = arith.constant 0.000000e+00 : f32
      %13 = vector.broadcast %cst_10 : f32 to vector<1x8x512xf32>
      %c0_11 = arith.constant 0 : index
      %c0_12 = arith.constant 0 : index
      %c0_13 = arith.constant 0 : index
      %14 = vector.load %arg4[%c0_11, %c0_12, %c0_13] : memref<1x8x512xf32, #tpu.memory_space<vmem>>, vector<1x8x512xf32>
      tpu.vector_store %arg4[%c0_11, %c0_12, %c0_13], %13 {strides = array<i32>} : memref<1x8x512xf32, #tpu.memory_space<vmem>>, vector<1x8x512xf32>,
    } else {
    }
    %c0 = arith.constant 0 : index
    %c0_1 = arith.constant 0 : index
    %3 = vector.load %arg2[%c0, %c0_1] : memref<8x512xf32, #tpu.memory_space<vmem>>, vector<8x512xf32>
    %c0_2 = arith.constant 0 : index
    %c0_3 = arith.constant 0 : index
    %4 = vector.load %arg3[%c0_2, %c0_3] : memref<8x512xf32, #tpu.memory_space<vmem>>, vector<8x512xf32>
    %5 = arith.subf %3, %4 : vector<8x512xf32>
    %6 = arith.mulf %5, %5 : vector<8x512xf32>
    %c0_4 = arith.constant 0 : index
    %c0_5 = arith.constant 0 : index
    %c0_6 = arith.constant 0 : index
    %7 = vector.load %arg4[%c0_4, %c0_5, %c0_6] : memref<1x8x512xf32, #tpu.memory_space<vmem>>, vector<1x8x512xf32>
    %8 = vector.shape_cast %6 : vector<8x512xf32> to vector<1x8x512xf32>
    %cst = arith.constant dense<0.000000e+00> : vector<8x512xf32>
    %9 = vector.multi_reduction <add>, %8, %cst [0] : vector<1x8x512xf32> to vector<8x512xf32>
    %10 = vector.shape_cast %9 : vector<8x512xf32> to vector<1x8x512xf32>
    %11 = arith.addf %7, %10 : vector<1x8x512xf32>
    %c0_7 = arith.constant 0 : index
    %c0_8 = arith.constant 0 : index
    %c0_9 = arith.constant 0 : index
    %12 = vector.load %arg4[%c0_7, %c0_8, %c0_9] : memref<1x8x512xf32, #tpu.memory_space<vmem>>, vector<1x8x512xf32>
    tpu.vector_store %arg4[%c0_7, %c0_8, %c0_9], %11 {strides = array<i32>} : memref<1x8x512xf32, #tpu.memory_space<vmem>>, vector<1x8x512xf32>,
    return
  }
  func.func @transform_0(%arg0: i32, %arg1: i32) -> (i32, i32) {
    %c1_i32 = arith.constant 1 : i32
    %0 = arith.muli %arg0, %c1_i32 : i32
    %1 = arith.addi %0, %arg1 : i32
    %c0_i32 = arith.constant 0 : i32
    %c0_i32_0 = arith.constant 0 : i32
    return %1, %c0_i32 : i32, i32
  }
  func.func @transform_1(%arg0: i32, %arg1: i32) -> (i32, i32) {
    %c1_i32 = arith.constant 1 : i32
    %0 = arith.muli %arg0, %c1_i32 : i32
    %1 = arith.addi %0, %arg1 : i32
    %c0_i32 = arith.constant 0 : i32
    %c0_i32_0 = arith.constant 0 : i32
    return %1, %c0_i32 : i32, i32
  }
  func.func @transform_2(%arg0: i32, %arg1: i32) -> (i32, i32, i32) {
    %c0_i32 = arith.constant 0 : i32
    %c0_i32_0 = arith.constant 0 : i32
    %c0_i32_1 = arith.constant 0 : i32
    return %arg0, %c0_i32, %c0_i32_0 : i32, i32, i32
  }
}

</mosaic_0001>

<bundles_post_ra>
// kernel: tpu_custom_call.1
= control target key start
LH: loop header
LB: loop body
LE: loop exit
PB: predicated region body
PF: predicated region fallthrough
CT: control target
= control target key end

     0   :  { %7 = vsyncpa [#allocation3], 0  ;;  %s217_s0 = inlined_call_operand.hbm [shape: f32[8,512], index: 0, kind: input, shape index: {}]   ;;  %s218_s1 = inlined_call_operand.hbm [shape: f32[8,512], index: 1, kind: input, shape index: {}]   ;;  %s219_s2 = inlined_call_operand.hbm [shape: f32[1,8,512], index: 2, kind: output, shape index: {}]  }
   0x1   :  { %8 = vsyncpa [#allocation6], 0 }
   0x2   :  { %9 = vsyncpa [#allocation4], 0  ;;  %s19_s11 = sshll.u32 %s217_s0, 4  ;;  %s190_s12 = smov [#allocation2]   ;;  %s20_s11 = int_to_ptr.hbm [resolvable:$true] %s19_s11 }
   0x3   :  { %s21_s13 = sshll.u32 %s190_s12, 4  ;;  %s34_s16 = sshll.u32 %s218_s1, 4  ;;  %s22_s13 = int_to_ptr.vmem [resolvable:$true] %s21_s13  ;;  %s35_s16 = int_to_ptr.hbm [resolvable:$true] %s34_s16 }
   0x4   :  { %24 = dma.hbm_to_vmem [thread:$0]  %s20_s11, 512, %s22_s13, [#allocation3]  }
   0x5   :  { %s191_s17 = smov [#allocation5]  }
   0x6   :  { %s36_s18 = sshll.u32 %s191_s17, 4  ;;  %s37_s18 = int_to_ptr.vmem [resolvable:$true] %s36_s18 }
   0x7   :  { %39 = dma.hbm_to_vmem [thread:$0]  %s35_s16, 512, %s37_s18, [#allocation6]  }
   0x8   :  { %184 = dma.done.wait [#allocation3], 512  }
   0x9   :  { %185 = vsyncadd [#allocation3], 4294966784 }
   0xa   :  { %186 = dma.done.wait [#allocation6], 512  }
   0xb   :  { %187 = vsyncadd [#allocation6], 4294966784  ;;  %v58_v0 = vld [vmem:[#allocation2] sm:$0xff]  ;;  %v59_v2 = vld [vmem:[#allocation2 + $0x8] sm:$0xff]  ;;  %s192_s0 = smov [#allocation7]   ;;  %s97_s21 = sshll.u32 %s219_s2, 4  ;;  %s98_s21 = int_to_ptr.hbm [resolvable:$true] %s97_s21 }
   0xc   :  { %v62_v1 = vld [vmem:[#allocation5] sm:$0xff]  ;;  %v63_v4 = vld [vmem:[#allocation5 + $0x8] sm:$0xff]  ;;  %v60_v5 = vld [vmem:[#allocation2 + $0x10] sm:$0xff]  ;;  %s95_s1 = sshll.u32 %s192_s0, 4  ;;  %s96_s1 = int_to_ptr.vmem [resolvable:$true] %s95_s1 }
   0xd   :  { %v66_v3 = vsub.f32 %v58_v0, %v62_v1  ;;  %v64_v6 = vld [vmem:[#allocation5 + $0x10] sm:$0xff]  ;;  %v67_v7 = vsub.f32 %v59_v2, %v63_v4  ;;  %v61_v9 = vld [vmem:[#allocation2 + $0x18] sm:$0xff] }
   0xe   :  { %v68_v8 = vsub.f32 %v60_v5, %v64_v6  ;;  %v65_v10 = vld [vmem:[#allocation5 + $0x18] sm:$0xff] }
   0xf   :  { %v70_v11 = vmul.f32 %v66_v3, %v66_v3  ;;  %v69_v12 = vsub.f32 %v61_v9, %v65_v10  ;;  %v71_v13 = vmul.f32 %v67_v7, %v67_v7 }
  0x10   :  { %v72_v14 = vmul.f32 %v68_v8, %v68_v8 }
  0x11   :  { %v73_v15 = vmul.f32 %v69_v12, %v69_v12  ;;  %86 = vst [vmem:[#allocation7] sm:$0xff] %v70_v11 }
  0x12   :  { %87 = vst [vmem:[#allocation7 + $0x8] sm:$0xff] %v71_v13 }
  0x13   :  { %88 = vst [vmem:[#allocation7 + $0x10] sm:$0xff] %v72_v14 }
  0x14   :  { %89 = vst [vmem:[#allocation7 + $0x18] sm:$0xff] %v73_v15 }
  0x15   :  { %100 = dma.vmem_to_hbm [thread:$0]  %s96_s1, 512, %s98_s21, [#allocation4]  }
  0x16   :  { %188 = dma.done.wait [#allocation4], 512  }
  0x17   :  { %189 = vsyncadd [#allocation4], 4294966784 }
  0x18   :  { %105 = vsyncpa [#allocation3], 1 }
  0x19   :  { %106 = vsyncpa [#allocation6], 1 }
  0x1a   :  { %107 = vsyncpa [#allocation4], 1 }

</bundles_post_ra>
